<compile_context>
chip_gen: v7x
topology: tpu7x:2x2x1
jax: 0.10.0
libtpu: 0.0.40
codegen_flags: <defaults>
</compile_context>

<pallas_src>
import jax
import jax.numpy as jnp
from jax.experimental import pallas as pl
from jax.experimental.pallas import tpu as pltpu

HIDDEN = 256
_ROW_ALIGN = 32          # sublane packing: 8 (f32), 16 (bf16), 32 (int8/fp8)


def _round_up(x, m):
    return (x + m - 1) // m * m


def _discriminator_kernel(xc_ref, w1_ref, b1_ref, w2_ref, b2_ref, out_ref):
    """One batch tile: fc1 -> ReLU -> fc2 -> sigmoid (concat pre-fused)."""
    # fc1: single K ~ 24 MXU matmul, f32 accumulation.
    h = jnp.dot(xc_ref[...], w1_ref[...], preferred_element_type=jnp.float32)
    h = jnp.maximum(h + b1_ref[...], 0.0)                        # [TB, 256] f32

    # fc2 (256 -> 1): VPU multiply + lane reduction (MXU stays free).
    logits = jnp.sum(h * w2_ref[...], axis=-1, keepdims=True) + b2_ref[0, 0]
    out_ref[...] = jax.nn.sigmoid(logits).astype(out_ref.dtype)


def discriminator_forward(x, c, params, *, compute_dtype=jnp.bfloat16,
                          block_batch=8192):
    """x: [B, input_size], c: [B, condition_size] -> [B, 1] probabilities."""
    w1, b1, w2, b2 = params                     # w1: [K, 256] (fc1.weight.T)
    B = x.shape[0]
    K = x.shape[1] + c.shape[1]

    # ---- batch tile selection -------------------------------------------
    # Multiple of 32 rows, capped at block_batch; if the batch is big enough,
    # make sure there are >= 2 grid steps so the two v7x TensorCores both work.
    tb = _round_up(min(block_batch, max(B, _ROW_ALIGN)), _ROW_ALIGN)
    if B >= 2 * _ROW_ALIGN:
        tb = min(tb, _round_up(-(-B // 2), _ROW_ALIGN))
    b_pad = _round_up(B, tb)
    grid = (b_pad // tb,)

    # ---- operands ---------------------------------------------------------
    # Fuse the concat in the wrapper: one activation stream, one MXU matmul.
    xc = jnp.concatenate([x, c], axis=1).astype(compute_dtype)
    if b_pad != B:
        xc = jnp.pad(xc, ((0, b_pad - B), (0, 0)))
    w1_p = w1.astype(compute_dtype)
    b1_p = b1.astype(jnp.float32)
    w2_p = w2.astype(jnp.float32)
    b2_p = b2.astype(jnp.float32)

    # ---- VMEM budget (per step, lane-padded), clamped for v7x's 64 MiB/TC --
    act_bytes = jnp.dtype(compute_dtype).itemsize
    lane_k = _round_up(K, 128)
    per_step_vmem = (
        2 * tb * lane_k * act_bytes        # xc tile, double-buffered
        + 2 * tb * 128 * 4                 # (tb,1) f32 output tile, lane-padded, x2
        + tb * HIDDEN * 4                  # f32 h temporary
        + K * HIDDEN * act_bytes           # resident W1
        + 2 * HIDDEN * 4 + 4)              # b1, w2, b2
    vmem_limit = min(48 * 1024 * 1024,
                     max(32 * 1024 * 1024, int(per_step_vmem * 3 // 2)))

    bytes_accessed = (
        b_pad * K * act_bytes              # xc read
        + K * HIDDEN * act_bytes           # W1
        + (2 * HIDDEN + 1) * 4             # b1, w2, b2 (f32)
        + b_pad * 4)                       # output

    grid_spec = pltpu.PrefetchScalarGridSpec(
        num_scalar_prefetch=0,
        grid=grid,
        in_specs=[
            pl.BlockSpec((tb, K), lambda i: (i, 0)),               # xc tile
            pl.BlockSpec((K, HIDDEN), lambda i: (0, 0)),           # W1 (resident)
            pl.BlockSpec((1, HIDDEN), lambda i: (0, 0)),           # b1
            pl.BlockSpec((1, HIDDEN), lambda i: (0, 0)),           # w2 row
            pl.BlockSpec(memory_space=pltpu.MemorySpace.SMEM),     # b2 scalar
        ],
        out_specs=pl.BlockSpec((tb, 1), lambda i: (i, 0)),
    )

    out = pl.pallas_call(
        _discriminator_kernel,
        out_shape=jax.ShapeDtypeStruct((b_pad, 1), jnp.float32),
        grid_spec=grid_spec,
        compiler_params=pltpu.CompilerParams(
            dimension_semantics=("parallel",),   # megacore-shard batch on v7x
            vmem_limit_bytes=vmem_limit,
        ),
        cost_estimate=pl.CostEstimate(
            flops=2 * b_pad * HIDDEN * (K + 1),
            transcendentals=b_pad,
            bytes_accessed=bytes_accessed,
        ),
    )(xc, w1_p, b1_p, w2_p, b2_p)

    return out[:B]


def init_params(key, input_size, condition_size):
    """nn.Linear-style uniform(+/-1/sqrt(fan_in)); W1 stored as [K, 256]."""
    f_in1 = input_size + condition_size
    k1, k2, k3, k4 = jax.random.split(key, 4)
    lim1 = 1.0 / jnp.sqrt(jnp.float32(f_in1))
    lim2 = 1.0 / jnp.sqrt(jnp.float32(HIDDEN))
    w1 = jax.random.uniform(k1, (f_in1, HIDDEN), jnp.float32, -lim1, lim1)
    b1 = jax.random.uniform(k2, (1, HIDDEN), jnp.float32, -lim1, lim1)
    w2 = jax.random.uniform(k3, (1, HIDDEN), jnp.float32, -lim2, lim2)  # fc2 weight row
    b2 = jax.random.uniform(k4, (1, 1), jnp.float32, -lim2, lim2)
    return w1, b1, w2, b2


def reference_forward(x, c, params):
    """Plain-JAX reference matching the PyTorch module."""
    w1, b1, w2, b2 = params
    xc = jnp.concatenate([x, c], axis=1)
    h = jnp.maximum(xc @ w1 + b1, 0.0)
    return jax.nn.sigmoid(h @ w2.T + b2)


if __name__ == "__main__":
    key = jax.random.PRNGKey(0)
    kx, kc, kp = jax.random.split(key, 3)

    batch, input_size, condition_size = 8, 16, 8
    x = jax.random.normal(kx, (batch, input_size), jnp.float32)
    c = jax.random.normal(kc, (batch, condition_size), jnp.float32)
    params = init_params(kp, input_size, condition_size)
    y_ref = reference_forward(x, c, params)

    # Default bf16-streamed path (f32 accumulate + f32 elementwise tail).
    out_bf16 = jax.block_until_ready(discriminator_forward(x, c, params))
    assert out_bf16.shape == (batch, 1)
    assert jnp.allclose(out_bf16, y_ref, atol=2e-2, rtol=2e-2)

    # f32 path (exact semantics of the PyTorch module).
    out_f32 = jax.block_until_ready(
        discriminator_forward(x, c, params, compute_dtype=jnp.float32))
    assert jnp.allclose(out_f32, y_ref, atol=1e-5, rtol=1e-5)

    # Ragged batch exercising padding, a multi-step pipelined grid, and the
    # >=2-step megacore split (B=300 -> tb=128, grid=(3,)).
    batch2 = 300
    x2 = jax.random.normal(kx, (batch2, input_size), jnp.float32)
    c2 = jax.random.normal(kc, (batch2, condition_size), jnp.float32)
    out2 = jax.block_until_ready(
        discriminator_forward(x2, c2, params, compute_dtype=jnp.float32,
                              block_batch=128))
    assert out2.shape == (batch2, 1)
    assert jnp.allclose(out2, reference_forward(x2, c2, params),
                        atol=1e-5, rtol=1e-5)

    print("KERNEL_OK")
</pallas_src>

<mosaic_0001>
module attributes {stable_mosaic.version = 11 : i64} {
  func.func @_discriminator_kernel(%arg0: i32, %arg1: memref<32x24xbf16, #tpu.memory_space<vmem>>, %arg2: memref<24x256xbf16, #tpu.memory_space<vmem>>, %arg3: memref<1x256xf32, #tpu.memory_space<vmem>>, %arg4: memref<1x256xf32, #tpu.memory_space<vmem>>, %arg5: memref<1x1xf32, #tpu.memory_space<smem>>, %arg6: memref<32x1xf32, #tpu.memory_space<vmem>>) attributes {dimension_semantics = [#tpu.dimension_semantics<parallel>], iteration_bounds = array<i64: 1>, scalar_prefetch = 0 : i64, scratch_operands = 0 : i64, tpu.core_type = #tpu.core_type<tc>, window_params = [{transform_indices = @transform_0, window_bounds = array<i64: 32, 24>}, {pipeline_mode = #tpu.pipeline_mode<synchronous>, transform_indices = @transform_1, window_bounds = array<i64: 24, 256>}, {pipeline_mode = #tpu.pipeline_mode<synchronous>, transform_indices = @transform_2, window_bounds = array<i64: 1, 256>}, {pipeline_mode = #tpu.pipeline_mode<synchronous>, transform_indices = @transform_3, window_bounds = array<i64: 1, 256>}, {transform_indices = @transform_4, window_bounds = array<i64: 1, 1>}, {transform_indices = @transform_5, window_bounds = array<i64: 32, 1>}]} {
    %c0 = arith.constant 0 : index
    %c0_0 = arith.constant 0 : index
    %0 = vector.load %arg1[%c0, %c0_0] : memref<32x24xbf16, #tpu.memory_space<vmem>>, vector<32x24xbf16>
    %c0_1 = arith.constant 0 : index
    %c0_2 = arith.constant 0 : index
    %1 = vector.load %arg2[%c0_1, %c0_2] : memref<24x256xbf16, #tpu.memory_space<vmem>>, vector<24x256xbf16>
    %cst = arith.constant dense<0.000000e+00> : vector<32x256xf32>
    %2 = tpu.matmul %0, %1, %cst {dimension_numbers = #tpu.dot_dimension_numbers<[1], [0], [0], [1], [0, 0, 1, 1], [], []>} : vector<32x24xbf16>, vector<24x256xbf16>, vector<32x256xf32> -> vector<32x256xf32>
    %c0_3 = arith.constant 0 : index
    %c0_4 = arith.constant 0 : index
    %3 = vector.load %arg3[%c0_3, %c0_4] : memref<1x256xf32, #tpu.memory_space<vmem>>, vector<1x256xf32>
    %4 = vector.broadcast %3 : vector<1x256xf32> to vector<32x256xf32>
    %5 = arith.addf %2, %4 : vector<32x256xf32>
    %cst_5 = arith.constant 0.000000e+00 : f32
    %6 = vector.broadcast %cst_5 : f32 to vector<32x256xf32>
    %7 = arith.maximumf %5, %6 : vector<32x256xf32>
    %c0_6 = arith.constant 0 : index
    %c0_7 = arith.constant 0 : index
    %8 = vector.load %arg4[%c0_6, %c0_7] : memref<1x256xf32, #tpu.memory_space<vmem>>, vector<1x256xf32>
    %9 = vector.broadcast %8 : vector<1x256xf32> to vector<32x256xf32>
    %10 = arith.mulf %7, %9 : vector<32x256xf32>
    %cst_8 = arith.constant dense<0.000000e+00> : vector<32xf32>
    %11 = vector.multi_reduction <add>, %10, %cst_8 [1] : vector<32x256xf32> to vector<32xf32>
    %12 = vector.shape_cast %11 : vector<32xf32> to vector<32x1xf32>
    %c0_9 = arith.constant 0 : index
    %c0_10 = arith.constant 0 : index
    %13 = memref.load %arg5[%c0_9, %c0_10] : memref<1x1xf32, #tpu.memory_space<smem>>
    %14 = vector.broadcast %13 : f32 to vector<32x1xf32>
    %15 = arith.addf %12, %14 : vector<32x1xf32>
    %16 = arith.negf %15 : vector<32x1xf32>
    %17 = math.exp %16 : vector<32x1xf32>
    %cst_11 = arith.constant 1.000000e+00 : f32
    %18 = vector.broadcast %cst_11 : f32 to vector<32x1xf32>
    %19 = arith.addf %18, %17 : vector<32x1xf32>
    %20 = arith.divf %18, %19 : vector<32x1xf32>
    %c0_12 = arith.constant 0 : index
    %c0_13 = arith.constant 0 : index
    %21 = vector.load %arg6[%c0_12, %c0_13] : memref<32x1xf32, #tpu.memory_space<vmem>>, vector<32x1xf32>
    tpu.vector_store %arg6[%c0_12, %c0_13], %20 {strides = array<i32>} : memref<32x1xf32, #tpu.memory_space<vmem>>, vector<32x1xf32>,
    return
  }
  func.func @transform_0(%arg0: i32) -> (i32, i32) {
    %c0_i32 = arith.constant 0 : i32
    %c0_i32_0 = arith.constant 0 : i32
    return %arg0, %c0_i32 : i32, i32
  }
  func.func @transform_1(%arg0: i32) -> (i32, i32) {
    %c0_i32 = arith.constant 0 : i32
    %c0_i32_0 = arith.constant 0 : i32
    %c0_i32_1 = arith.constant 0 : i32
    return %c0_i32, %c0_i32_0 : i32, i32
  }
  func.func @transform_2(%arg0: i32) -> (i32, i32) {
    %c0_i32 = arith.constant 0 : i32
    %c0_i32_0 = arith.constant 0 : i32
    %c0_i32_1 = arith.constant 0 : i32
    return %c0_i32, %c0_i32_0 : i32, i32
  }
  func.func @transform_3(%arg0: i32) -> (i32, i32) {
    %c0_i32 = arith.constant 0 : i32
    %c0_i32_0 = arith.constant 0 : i32
    %c0_i32_1 = arith.constant 0 : i32
    return %c0_i32, %c0_i32_0 : i32, i32
  }
  func.func @transform_4(%arg0: i32) -> (i32, i32) {
    %c0_i32 = arith.constant 0 : i32
    %c0_i32_0 = arith.constant 0 : i32
    %c0_i32_1 = arith.constant 0 : i32
    return %c0_i32, %c0_i32_0 : i32, i32
  }
  func.func @transform_5(%arg0: i32) -> (i32, i32) {
    %c0_i32 = arith.constant 0 : i32
    %c0_i32_0 = arith.constant 0 : i32
    return %arg0, %c0_i32 : i32, i32
  }
}

</mosaic_0001>

<bundles_post_ra>
// kernel: tpu_custom_call.1
= control target key start
LH: loop header
LB: loop body
LE: loop exit
PB: predicated region body
PF: predicated region fallthrough
CT: control target
= control target key end

     0   :  { %v253_v1 = vmov 0   ;;  %vm73_vm0 = vcmask 1043456   ;;  %vm66_vm1 = vcmask 195584   ;;  %v31_v9 = vlaneseq  ;;  %s320_s1 = inlined_call_operand.vmem [shape: bf16[24,256], index: 1, kind: input, shape index: {}]   ;;  %s321_s0 = inlined_call_operand.vmem [shape: bf16[32,24], index: 0, kind: input, shape index: {}]   ;;  %s322_s2 = inlined_call_operand.vmem [shape: f32[1,256], index: 2, kind: input, shape index: {}]   ;;  %s323_s3 = inlined_call_operand.vmem [shape: f32[1,256], index: 3, kind: input, shape index: {}]   ;;  %s324_s4 = inlined_call_operand.<no memory space> [shape: f32[1,1], index: 4, kind: input, shape index: {}]   ;;  %s325_s5 = inlined_call_operand.vmem [shape: f32[32,1], index: 5, kind: output, shape index: {}]  }
   0x1   :  { %v28_v0 = vld [vmem:[%s320_s1 + $0x10] sm:$0xff]  ;;  %112 = vmatprep.mubr.bf16.mxu0 %v253_v1  ;;  %122 = vmatprep.mubr.bf16.mxu1 %v253_v1  ;;  %v230_v2 = vld [vmem:[%s320_s1 + $0x4] ss:$8 sps:$4 sm:$0xff]   ;;  %v232_v3 = vld [vmem:[%s320_s1] ss:$8 sps:$4 sm:$0xff]   ;;  %v174_v55 = vstv %s324_s4  ;;  %vm203_vm2 = vcmask 7168  }
   0x2   :  { %v217_v4 = vcombine.high %v28_v0, %v28_v0  ;;  %v216_v5 = vcombine.low %v28_v0, %v28_v0  ;;  %80 = vmatprep.subr.bf16.mxu0 %v230_v2  ;;  %225 = vmatprep.subr.bf16.mxu1 %v230_v2  ;;  %v235_v7 = vld [vmem:[%s321_s0] sm:$0xff]   ;;  %v236_v8 = vld [vmem:[%s321_s0 + $0x8] sm:$0xff]   ;;  %v32_v10 = vshrl.u32 %v31_v9, 7 }
   0x3   :  { %81 = vmatpush1.bf16.msra.mxu0 %v232_v3  ;;  %227 = vmatpush1.bf16.msra.mxu1 %v232_v3  ;;  %v29_v12 = vld [vmem:[%s322_s2] sm:$0x3] }
   0x4   :  { %218 = vmatprep.subr.msk.bf16.mxu0 %vm73_vm0, %v217_v4  ;;  %226 = vmatprep.subr.msk.bf16.mxu1 %vm73_vm0, %v217_v4  ;;  %v75_v6 = vsel %vm73_vm0, %v216_v5, 0  ;;  %v33_v11 = vsub.s32 0, %v32_v10  ;;  %v37_v13 = vsub.s32 1, %v32_v10  ;;  %v141_v16 = vld [vmem:[%s323_s3] sm:$0x3] }
   0x6   :  { %v34_v14 = vrot.slane %v29_v12, %v33_v11  ;;  %v38_v15 = vrot.slane %v29_v12, %v37_v13  ;;  %v146_v23 = vrot.slane %v141_v16, %v33_v11  ;;  %v150_v28 = vrot.slane %v141_v16, %v37_v13 }
   0x7   :  { %83 = vmatpush1.bf16.msra.mxu0 %v75_v6  ;;  %228 = vmatpush1.bf16.msra.mxu1 %v75_v6 }
   0xa   :  { %219 = vmatmul.mubr.msk.bf16.vlgmr.msra.gmra.mrb[0].mxu0 %vm66_vm1, %v235_v7  ;;  %220 = vmatmul.mubr.msk.bf16.vlgmr.msra.gmra.mrb[0].mxu1 %vm66_vm1, %v236_v8 }
  0xdd   :  { %v114_v17 = vpop.f32.mrb[0].mxu0  ;;  %v124_v18 = vpop.f32.mrb[0].mxu1 }
  0xde   :  { %v115_v19 = vadd.f32 %v114_v17, %v34_v14  ;;  %v125_v20 = vadd.f32 %v124_v18, %v34_v14  ;;  %v116_v21 = vpop.f32.mrb[1].mxu0  ;;  %v126_v22 = vpop.f32.mrb[1].mxu1 }
  0xdf   :  { %v117_v24 = vadd.f32 %v116_v21, %v38_v15  ;;  %v127_v25 = vadd.f32 %v126_v22, %v38_v15  ;;  %v118_v26 = vpop.f32.mrb[2].mxu0  ;;  %v128_v27 = vpop.f32.mrb[2].mxu1 }
  0xe0   :  { %v133_v29 = vmax.f32 %v115_v19, 0.0  ;;  %v137_v30 = vmax.f32 %v125_v20, 0.0  ;;  %v119_v31 = vadd.f32 %v118_v26, %v34_v14  ;;  %v129_v32 = vadd.f32 %v128_v27, %v34_v14  ;;  %v120_v33 = vpop.f32.mrb[3].mxu0  ;;  %v130_v34 = vpop.f32.mrb[3].mxu1 }
  0xe1   :  { %v134_v35 = vmax.f32 %v117_v24, 0.0  ;;  %v138_v36 = vmax.f32 %v127_v25, 0.0  ;;  %v121_v37 = vadd.f32 %v120_v33, %v38_v15  ;;  %v131_v38 = vadd.f32 %v130_v34, %v38_v15 }
  0xe2   :  { %v135_v39 = vmax.f32 %v119_v31, 0.0  ;;  %v139_v40 = vmax.f32 %v129_v32, 0.0  ;;  %v157_v41 = vmul.f32 %v146_v23, %v137_v30  ;;  %v153_v42 = vmul.f32 %v146_v23, %v133_v29 }
  0xe3   :  { %v136_v43 = vmax.f32 %v121_v37, 0.0  ;;  %v140_v44 = vmax.f32 %v131_v38, 0.0  ;;  %v158_v45 = vmul.f32 %v150_v28, %v138_v36  ;;  %v154_v46 = vmul.f32 %v150_v28, %v134_v35 }
  0xe4   :  { %v155_v47 = vmul.f32 %v146_v23, %v135_v39  ;;  %v159_v48 = vmul.f32 %v146_v23, %v139_v40 }
  0xe5   :  { %v156_v49 = vmul.f32 %v150_v28, %v136_v43  ;;  %v160_v50 = vmul.f32 %v150_v28, %v140_v44  ;;  %v167_v51 = vadd.f32 %v158_v45, %v157_v41  ;;  %v161_v52 = vadd.f32 %v154_v46, %v153_v42 }
  0xe7   :  { %168 = vadd.xlane.f32.xlu1 %v167_v51  ;;  %162 = vadd.xlane.f32.xlu0 %v161_v52  ;;  %v170_v53 = vadd.f32 %v160_v50, %v159_v48  ;;  %v164_v54 = vadd.f32 %v156_v49, %v155_v47 }
  0xeb   :  { %171 = vadd.xlane.f32.xlu1 %v170_v53  ;;  %165 = vadd.xlane.f32.xlu0 %v164_v54 }
 0x174   :  { %v169_v56 = vpop.xlane.xlu1 %168  ;;  %v163_v57 = vpop.xlane.xlu0 %162 }
 0x175   :  { %v177_v58 = vadd.f32 %v174_v55, %v169_v56  ;;  %v175_v59 = vadd.f32 %v174_v55, %v163_v57 }
 0x177   :  { %v223_v60 = vmul.f32 -1.442695, %v177_v58  ;;  %v221_v61 = vmul.f32 -1.442695, %v175_v59 }
 0x178   :  { %v172_v62 = vpop.xlane.xlu1 %171  ;;  %v166_v63 = vpop.xlane.xlu0 %165 }
 0x179   :  { %237 = vpow2.f32 %v223_v60  ;;  %v178_v0 = vadd.f32 %v174_v55, %v172_v62  ;;  %v176_v1 = vadd.f32 %v174_v55, %v166_v63 }
 0x17a   :  { %239 = vpow2.f32 %v221_v61 }
 0x17b   :  { %v224_v2 = vmul.f32 -1.442695, %v178_v0  ;;  %v222_v3 = vmul.f32 -1.442695, %v176_v1 }
 0x17d   :  { %241 = vpow2.f32 %v224_v2 }
 0x17e   :  { %243 = vpow2.f32 %v222_v3 }
 0x183   :  { %v238_v4 = vpop.eup %237 }
 0x184   :  { %v240_v5 = vpop.eup %239  ;;  %v193_v6 = vadd.f32 1.0, %v238_v4 }
 0x185   :  { %v191_v7 = vadd.f32 1.0, %v240_v5 }
 0x186   :  { %245 = vrcp.f32 %v193_v6 }
 0x187   :  { %v242_v8 = vpop.eup %241  ;;  %247 = vrcp.f32 %v191_v7 }
 0x188   :  { %v244_v9 = vpop.eup %243  ;;  %v194_v10 = vadd.f32 1.0, %v242_v8 }
 0x189   :  { %v192_v11 = vadd.f32 1.0, %v244_v9 }
 0x18a   :  { %249 = vrcp.f32 %v194_v10 }
 0x18b   :  { %251 = vrcp.f32 %v192_v11 }
 0x190   :  { %v246_v12 = vpop.eup %245 }
 0x191   :  { %v248_v13 = vpop.eup %247  ;;  %206 = vst.msk [vmem:[%s325_s5 + $0x10] sm:$0xff] %vm203_vm2, %v246_v12 }
 0x192   :  { %204 = vst.msk [vmem:[%s325_s5] sm:$0xff] %vm203_vm2, %v248_v13 }
 0x194   :  { %v250_v14 = vpop.eup %249 }
 0x195   :  { %v252_v15 = vpop.eup %251  ;;  %207 = vst.msk [vmem:[%s325_s5 + $0x18] sm:$0xff] %vm203_vm2, %v250_v14 }
 0x196   :  { %205 = vst.msk [vmem:[%s325_s5 + $0x8] sm:$0xff] %vm203_vm2, %v252_v15 }

</bundles_post_ra>
